<compile_context>
chip_gen: v5e
topology: v5e:2x2
jax: 0.10.0
libtpu: 0.0.40
codegen_flags: <defaults>
</compile_context>

<pallas_src>
import functools

import numpy as np
import jax
import jax.numpy as jnp
from jax import lax
from jax.experimental import pallas as pl
from jax.experimental.pallas import tpu as pltpu

LANE = 128  # TPU lane width; conv output channels are zero-padded to a multiple


def _vmem():
    return pl.BlockSpec(memory_space=pltpu.MemorySpace.VMEM)


# ----------------------------- Pallas kernels ------------------------------

def conv_relu_pool_kernel(p_ref, w_ref, b_ref, o_ref):
    """Fused conv(im2col matmul) + bias + ReLU + MaxPool2d(2, 2).

    p_ref: (4*N, K)  bf16  im2col patches; 4 contiguous row-groups of N rows,
                           one per position inside the 2x2 pooling window,
                           each group ordered (batch, out_row, out_col).
    w_ref: (K, Cpad) bf16  conv weight as matmul operand, Cout zero-padded to
                           a multiple of 128 lanes (lane-dense stores).
    b_ref: (1, Cpad) f32   conv bias (zeros in padded lanes).
    o_ref: (N, Cpad) bf16  pooled activations.
    """
    n = o_ref.shape[0]
    # One big MXU push over all batch * spatial * pool-quadrant rows.
    y = jnp.dot(p_ref[...], w_ref[...], preferred_element_type=jnp.float32)
    y = jnp.maximum(y + b_ref[...], 0.0)                       # bias + ReLU
    # MaxPool2d(2, 2): elementwise max of the 4 quadrant row-groups (VPU).
    pooled = jnp.maximum(jnp.maximum(y[0:n], y[n:2 * n]),
                         jnp.maximum(y[2 * n:3 * n], y[3 * n:4 * n]))
    o_ref[...] = pooled.astype(o_ref.dtype)


def mlp_softmax_kernel(x_ref, w2_ref, b2_ref, w1_ref, b1_ref, wo_ref, bo_ref,
                       o_ref):
    """fc_dec2 -> ReLU -> fc_dec1 -> ReLU -> fc_out -> Softmax(dim=1)."""
    h = jnp.dot(x_ref[...], w2_ref[...], preferred_element_type=jnp.float32)
    h = jnp.maximum(h + b2_ref[...], 0.0)
    h = jnp.dot(h.astype(w1_ref.dtype), w1_ref[...],
                preferred_element_type=jnp.float32)
    h = jnp.maximum(h + b1_ref[...], 0.0)
    logits = jnp.dot(h.astype(wo_ref.dtype), wo_ref[...],
                     preferred_element_type=jnp.float32) + bo_ref[...]
    m = jnp.max(logits, axis=-1, keepdims=True)
    e = jnp.exp(logits - m)
    denom = jnp.sum(e, axis=-1, keepdims=True)
    o_ref[...] = (e * pl.reciprocal(denom, approx=True)).astype(o_ref.dtype)


# ------------------------------- JAX glue ----------------------------------

def _extract_patches(x_nhwc, k, pad):
    """[B, H, W, Cin] -> [B, H, W, k*k*Cin] (feature order = (dy, dx, cin))."""
    B, H, W, Cin = x_nhwc.shape
    xp = jnp.pad(x_nhwc, ((0, 0), (pad, pad), (pad, pad), (0, 0)))
    cols = []
    for dy in range(k):
        for dx in range(k):
            cols.append(xp[:, dy:dy + H, dx:dx + W, :])
    return jnp.concatenate(cols, axis=-1)


def conv_relu_pool_block(x_nhwc, wm, bm, cout, kern_size, pad):
    """One conv -> ReLU -> MaxPool(2,2) block as a single grid-less pallas_call."""
    B, H, W, Cin = x_nhwc.shape
    Ho, Wo = H // 2, W // 2
    N = B * Ho * Wo
    K = kern_size * kern_size * Cin
    cpad = wm.shape[1]

    patches = _extract_patches(x_nhwc, kern_size, pad)            # (B,H,W,K)
    # Group rows by 2x2-pool quadrant (quadrant-major), batch/spatial inside:
    # (B,Ho,2,Wo,2,K) -> (2,2,B,Ho,Wo,K) -> (4*N, K)
    p = (patches.reshape(B, Ho, 2, Wo, 2, K)
                .transpose(2, 4, 0, 1, 3, 5)
                .reshape(4 * N, K))

    out = pl.pallas_call(
        conv_relu_pool_kernel,
        out_shape=jax.ShapeDtypeStruct((N, cpad), jnp.bfloat16),
        in_specs=[_vmem(), _vmem(), _vmem()],
        out_specs=_vmem(),
    )(p, wm, bm)
    # Drop the zero-padded channels and restore NHWC (free XLA reshape/slice).
    return out[:, :cout].reshape(B, Ho, Wo, cout)


@functools.partial(jax.jit, static_argnames=("couts", "kern_size"))
def hpsearchnet_forward(x_nchw, kp, *, couts, kern_size=3):
    pad = kern_size // 2
    x = jnp.transpose(x_nchw, (0, 2, 3, 1)).astype(jnp.bfloat16)   # NCHW->NHWC
    for (wm, bm), cout in zip(kp["convs"], couts):
        x = conv_relu_pool_block(x, wm, bm, cout, kern_size, pad)
    B = x.shape[0]
    # NHWC flatten.  fc_dec2's input columns were pre-permuted to this order,
    # so the activation needs no NHWC->NCHW transpose before the FC stack.
    xf = x.reshape(B, -1)

    w2, b2 = kp["fc_dec2"]
    w1, b1 = kp["fc_dec1"]
    wo, bo = kp["fc_out"]
    n_cls = wo.shape[1]
    return pl.pallas_call(
        mlp_softmax_kernel,
        out_shape=jax.ShapeDtypeStruct((B, n_cls), jnp.float32),
        in_specs=[_vmem()] * 7,
        out_specs=_vmem(),
    )(xf, w2, b2, w1, b1, wo, bo)


# -------------------- one-time parameter repacking (outside jit) ------------

def prepare_kernel_params(params, kern_size, in_shape):
    """Repack PyTorch-layout parameters into kernel-ready matmul operands."""
    convs, couts = [], []
    for (w, b) in params["convs"]:
        cout, cin = int(w.shape[0]), int(w.shape[1])
        K = kern_size * kern_size * cin
        cpad = -(-cout // LANE) * LANE
        # [Cout,Cin,kH,kW] -> [(dy,dx,cin), Cout], matching _extract_patches order
        wm = jnp.transpose(w, (2, 3, 1, 0)).reshape(K, cout)
        wm = jnp.pad(wm, ((0, 0), (0, cpad - cout))).astype(jnp.bfloat16)
        bm = jnp.pad(b, (0, cpad - cout)).reshape(1, cpad).astype(jnp.float32)
        convs.append((wm, bm))
        couts.append(cout)

    c_last = couts[-1]
    sp = (in_shape // 2 ** len(couts)) ** 2          # Ho*Wo after all pools
    w2, b2 = params["fc_dec2"]
    f4 = int(w2.shape[0])
    # Permute fc_dec2's input dim from NCHW flatten (c, ho, wo) to NHWC
    # flatten (ho, wo, c) so the kernel can consume the NHWC activation as-is.
    w2p = (w2.T.reshape(c_last, sp, f4).transpose(1, 0, 2)
               .reshape(c_last * sp, f4)).astype(jnp.bfloat16)
    w1, b1 = params["fc_dec1"]
    wo, bo = params["fc_out"]
    kp = {
        "convs": convs,
        "fc_dec2": (w2p, b2.reshape(1, -1).astype(jnp.float32)),
        "fc_dec1": (w1.T.astype(jnp.bfloat16),
                    b1.reshape(1, -1).astype(jnp.float32)),
        "fc_out": (wo.T.astype(jnp.bfloat16),
                   bo.reshape(1, -1).astype(jnp.float32)),
    }
    return kp, tuple(couts)


# ----------------------- deterministic parameter init ----------------------

def init_params(key, cnn_filt_num=16, kern_size=3, in_shape=16):
    ks = jax.random.split(key, 12)

    def conv_init(k, cout, cin):
        fan = cin * kern_size * kern_size
        return jax.random.normal(k, (cout, cin, kern_size, kern_size),
                                 jnp.float32) / np.sqrt(fan)

    def lin_init(k, out_f, in_f):
        return jax.random.normal(k, (out_f, in_f), jnp.float32) / np.sqrt(in_f)

    c1, c2, c3 = cnn_filt_num, cnn_filt_num * 2, cnn_filt_num * 4
    convs = [
        (conv_init(ks[0], c1, 1),  0.01 * jax.random.normal(ks[1], (c1,), jnp.float32)),
        (conv_init(ks[2], c2, c1), 0.01 * jax.random.normal(ks[3], (c2,), jnp.float32)),
        (conv_init(ks[4], c3, c2), 0.01 * jax.random.normal(ks[5], (c3,), jnp.float32)),
    ]
    fs = c3 * (in_shape // 2 ** 3) ** 2
    fc_dec2 = (lin_init(ks[6], fs // 4, fs),
               0.01 * jax.random.normal(ks[7], (fs // 4,), jnp.float32))
    fc_dec1 = (lin_init(ks[8], fs // 16, fs // 4),
               0.01 * jax.random.normal(ks[9], (fs // 16,), jnp.float32))
    fc_out = (lin_init(ks[10], 10, fs // 16),
              0.01 * jax.random.normal(ks[11], (10,), jnp.float32))
    return {"convs": convs, "fc_dec2": fc_dec2, "fc_dec1": fc_dec1,
            "fc_out": fc_out}


# --------------------------- pure-JAX reference -----------------------------

def reference_forward(x_nchw, params):
    x = x_nchw
    for w, b in params["convs"]:
        y = lax.conv_general_dilated(
            x, w, window_strides=(1, 1), padding=((1, 1), (1, 1)),
            dimension_numbers=("NCHW", "OIHW", "NCHW"))
        y = y + b[None, :, None, None]
        y = jnp.maximum(y, 0.0)
        y = lax.reduce_window(y, -jnp.inf, lax.max,
                              window_dimensions=(1, 1, 2, 2),
                              window_strides=(1, 1, 2, 2), padding="VALID")
        x = y
    B = x.shape[0]
    x = x.reshape(B, -1)
    (w2, b2) = params["fc_dec2"]
    (w1, b1) = params["fc_dec1"]
    (wo, bo) = params["fc_out"]
    x = jnp.maximum(x @ w2.T + b2, 0.0)
    x = jnp.maximum(x @ w1.T + b1, 0.0)
    logits = x @ wo.T + bo
    return jax.nn.softmax(logits, axis=1)


# --------------------------------- main -------------------------------------

if __name__ == "__main__":
    key = jax.random.PRNGKey(0)
    kp_key, kx = jax.random.split(key)

    B, in_shape = 2, 16                       # small shapes; in_shape % 8 == 0
    params = init_params(kp_key, cnn_filt_num=16, kern_size=3, in_shape=in_shape)
    x = jax.random.normal(kx, (B, 1, in_shape, in_shape), jnp.float32)

    kparams, couts = prepare_kernel_params(params, kern_size=3, in_shape=in_shape)

    out = hpsearchnet_forward(x, kparams, couts=couts, kern_size=3)
    out = jax.block_until_ready(out)

    assert out.shape == (B, 10)
    out_np = np.asarray(out)
    assert np.all(np.isfinite(out_np))
    # approx reciprocal in the softmax tail -> rows sum to 1 within ~1e-3
    np.testing.assert_allclose(out_np.sum(axis=1), np.ones(B), atol=5e-3)

    # f32 XLA reference vs. bf16-matmul Pallas path
    ref = np.asarray(reference_forward(x, params))
    np.testing.assert_allclose(out_np, ref, atol=3e-2, rtol=3e-2)

    print("KERNEL_OK")
</pallas_src>

<mosaic_0001>
module attributes {stable_mosaic.version = 11 : i64} {
  func.func @conv_relu_pool_kernel(%arg0: memref<512x9xbf16, #tpu.memory_space<vmem>>, %arg1: memref<9x128xbf16, #tpu.memory_space<vmem>>, %arg2: memref<1x128xf32, #tpu.memory_space<vmem>>, %arg3: memref<128x128xbf16, #tpu.memory_space<vmem>>) attributes {dimension_semantics = [], scalar_prefetch = 0 : i64, scratch_operands = 0 : i64, tpu.core_type = #tpu.core_type<tc>} {
    %c0 = arith.constant 0 : index
    %c0_0 = arith.constant 0 : index
    %0 = vector.load %arg0[%c0, %c0_0] : memref<512x9xbf16, #tpu.memory_space<vmem>>, vector<512x9xbf16>
    %c0_1 = arith.constant 0 : index
    %c0_2 = arith.constant 0 : index
    %1 = vector.load %arg1[%c0_1, %c0_2] : memref<9x128xbf16, #tpu.memory_space<vmem>>, vector<9x128xbf16>
    %cst = arith.constant dense<0.000000e+00> : vector<512x128xf32>
    %2 = tpu.matmul %0, %1, %cst {dimension_numbers = #tpu.dot_dimension_numbers<[1], [0], [0], [1], [0, 0, 1, 1], [], []>} : vector<512x9xbf16>, vector<9x128xbf16>, vector<512x128xf32> -> vector<512x128xf32>
    %c0_3 = arith.constant 0 : index
    %c0_4 = arith.constant 0 : index
    %3 = vector.load %arg2[%c0_3, %c0_4] : memref<1x128xf32, #tpu.memory_space<vmem>>, vector<1x128xf32>
    %4 = vector.broadcast %3 : vector<1x128xf32> to vector<512x128xf32>
    %5 = arith.addf %2, %4 : vector<512x128xf32>
    %cst_5 = arith.constant 0.000000e+00 : f32
    %6 = vector.broadcast %cst_5 : f32 to vector<512x128xf32>
    %7 = arith.maximumf %5, %6 : vector<512x128xf32>
    %8 = vector.extract_strided_slice %7 {offsets = [0, 0], sizes = [128, 128], strides = [1, 1]} : vector<512x128xf32> to vector<128x128xf32>
    %9 = vector.extract_strided_slice %7 {offsets = [128, 0], sizes = [128, 128], strides = [1, 1]} : vector<512x128xf32> to vector<128x128xf32>
    %10 = arith.maximumf %8, %9 : vector<128x128xf32>
    %11 = vector.extract_strided_slice %7 {offsets = [256, 0], sizes = [128, 128], strides = [1, 1]} : vector<512x128xf32> to vector<128x128xf32>
    %12 = vector.extract_strided_slice %7 {offsets = [384, 0], sizes = [128, 128], strides = [1, 1]} : vector<512x128xf32> to vector<128x128xf32>
    %13 = arith.maximumf %11, %12 : vector<128x128xf32>
    %14 = arith.maximumf %10, %13 : vector<128x128xf32>
    %15 = arith.truncf %14 : vector<128x128xf32> to vector<128x128xbf16>
    %c0_6 = arith.constant 0 : index
    %c0_7 = arith.constant 0 : index
    %16 = vector.load %arg3[%c0_6, %c0_7] : memref<128x128xbf16, #tpu.memory_space<vmem>>, vector<128x128xbf16>
    tpu.vector_store %arg3[%c0_6, %c0_7], %15 {strides = array<i32>} : memref<128x128xbf16, #tpu.memory_space<vmem>>, vector<128x128xbf16>,
    return
  }
}

module attributes {stable_mosaic.version = 11 : i64} {
  func.func @conv_relu_pool_kernel(%arg0: memref<128x144xbf16, #tpu.memory_space<vmem>>, %arg1: memref<144x128xbf16, #tpu.memory_space<vmem>>, %arg2: memref<1x128xf32, #tpu.memory_space<vmem>>, %arg3: memref<32x128xbf16, #tpu.memory_space<vmem>>) attributes {dimension_semantics = [], scalar_prefetch = 0 : i64, scratch_operands = 0 : i64, tpu.core_type = #tpu.core_type<tc>} {
    %c0 = arith.constant 0 : index
    %c0_0 = arith.constant 0 : index
    %0 = vector.load %arg0[%c0, %c0_0] : memref<128x144xbf16, #tpu.memory_space<vmem>>, vector<128x144xbf16>
    %c0_1 = arith.constant 0 : index
    %c0_2 = arith.constant 0 : index
    %1 = vector.load %arg1[%c0_1, %c0_2] : memref<144x128xbf16, #tpu.memory_space<vmem>>, vector<144x128xbf16>
    %cst = arith.constant dense<0.000000e+00> : vector<128x128xf32>
    %2 = tpu.matmul %0, %1, %cst {dimension_numbers = #tpu.dot_dimension_numbers<[1], [0], [0], [1], [0, 0, 1, 1], [], []>} : vector<128x144xbf16>, vector<144x128xbf16>, vector<128x128xf32> -> vector<128x128xf32>
    %c0_3 = arith.constant 0 : index
    %c0_4 = arith.constant 0 : index
    %3 = vector.load %arg2[%c0_3, %c0_4] : memref<1x128xf32, #tpu.memory_space<vmem>>, vector<1x128xf32>
    %4 = vector.broadcast %3 : vector<1x128xf32> to vector<128x128xf32>
    %5 = arith.addf %2, %4 : vector<128x128xf32>
    %cst_5 = arith.constant 0.000000e+00 : f32
    %6 = vector.broadcast %cst_5 : f32 to vector<128x128xf32>
    %7 = arith.maximumf %5, %6 : vector<128x128xf32>
    %8 = vector.extract_strided_slice %7 {offsets = [0, 0], sizes = [32, 128], strides = [1, 1]} : vector<128x128xf32> to vector<32x128xf32>
    %9 = vector.extract_strided_slice %7 {offsets = [32, 0], sizes = [32, 128], strides = [1, 1]} : vector<128x128xf32> to vector<32x128xf32>
    %10 = arith.maximumf %8, %9 : vector<32x128xf32>
    %11 = vector.extract_strided_slice %7 {offsets = [64, 0], sizes = [32, 128], strides = [1, 1]} : vector<128x128xf32> to vector<32x128xf32>
    %12 = vector.extract_strided_slice %7 {offsets = [96, 0], sizes = [32, 128], strides = [1, 1]} : vector<128x128xf32> to vector<32x128xf32>
    %13 = arith.maximumf %11, %12 : vector<32x128xf32>
    %14 = arith.maximumf %10, %13 : vector<32x128xf32>
    %15 = arith.truncf %14 : vector<32x128xf32> to vector<32x128xbf16>
    %c0_6 = arith.constant 0 : index
    %c0_7 = arith.constant 0 : index
    %16 = vector.load %arg3[%c0_6, %c0_7] : memref<32x128xbf16, #tpu.memory_space<vmem>>, vector<32x128xbf16>
    tpu.vector_store %arg3[%c0_6, %c0_7], %15 {strides = array<i32>} : memref<32x128xbf16, #tpu.memory_space<vmem>>, vector<32x128xbf16>,
    return
  }
}

module attributes {stable_mosaic.version = 11 : i64} {
  func.func @conv_relu_pool_kernel(%arg0: memref<32x288xbf16, #tpu.memory_space<vmem>>, %arg1: memref<288x128xbf16, #tpu.memory_space<vmem>>, %arg2: memref<1x128xf32, #tpu.memory_space<vmem>>, %arg3: memref<8x128xbf16, #tpu.memory_space<vmem>>) attributes {dimension_semantics = [], scalar_prefetch = 0 : i64, scratch_operands = 0 : i64, tpu.core_type = #tpu.core_type<tc>} {
    %c0 = arith.constant 0 : index
    %c0_0 = arith.constant 0 : index
    %0 = vector.load %arg0[%c0, %c0_0] : memref<32x288xbf16, #tpu.memory_space<vmem>>, vector<32x288xbf16>
    %c0_1 = arith.constant 0 : index
    %c0_2 = arith.constant 0 : index
    %1 = vector.load %arg1[%c0_1, %c0_2] : memref<288x128xbf16, #tpu.memory_space<vmem>>, vector<288x128xbf16>
    %cst = arith.constant dense<0.000000e+00> : vector<32x128xf32>
    %2 = tpu.matmul %0, %1, %cst {dimension_numbers = #tpu.dot_dimension_numbers<[1], [0], [0], [1], [0, 0, 1, 1], [], []>} : vector<32x288xbf16>, vector<288x128xbf16>, vector<32x128xf32> -> vector<32x128xf32>
    %c0_3 = arith.constant 0 : index
    %c0_4 = arith.constant 0 : index
    %3 = vector.load %arg2[%c0_3, %c0_4] : memref<1x128xf32, #tpu.memory_space<vmem>>, vector<1x128xf32>
    %4 = vector.broadcast %3 : vector<1x128xf32> to vector<32x128xf32>
    %5 = arith.addf %2, %4 : vector<32x128xf32>
    %cst_5 = arith.constant 0.000000e+00 : f32
    %6 = vector.broadcast %cst_5 : f32 to vector<32x128xf32>
    %7 = arith.maximumf %5, %6 : vector<32x128xf32>
    %8 = vector.extract_strided_slice %7 {offsets = [0, 0], sizes = [8, 128], strides = [1, 1]} : vector<32x128xf32> to vector<8x128xf32>
    %9 = vector.extract_strided_slice %7 {offsets = [8, 0], sizes = [8, 128], strides = [1, 1]} : vector<32x128xf32> to vector<8x128xf32>
    %10 = arith.maximumf %8, %9 : vector<8x128xf32>
    %11 = vector.extract_strided_slice %7 {offsets = [16, 0], sizes = [8, 128], strides = [1, 1]} : vector<32x128xf32> to vector<8x128xf32>
    %12 = vector.extract_strided_slice %7 {offsets = [24, 0], sizes = [8, 128], strides = [1, 1]} : vector<32x128xf32> to vector<8x128xf32>
    %13 = arith.maximumf %11, %12 : vector<8x128xf32>
    %14 = arith.maximumf %10, %13 : vector<8x128xf32>
    %15 = arith.truncf %14 : vector<8x128xf32> to vector<8x128xbf16>
    %c0_6 = arith.constant 0 : index
    %c0_7 = arith.constant 0 : index
    %16 = vector.load %arg3[%c0_6, %c0_7] : memref<8x128xbf16, #tpu.memory_space<vmem>>, vector<8x128xbf16>
    tpu.vector_store %arg3[%c0_6, %c0_7], %15 {strides = array<i32>} : memref<8x128xbf16, #tpu.memory_space<vmem>>, vector<8x128xbf16>,
    return
  }
}

module attributes {stable_mosaic.version = 11 : i64} {
  func.func @mlp_softmax_kernel(%arg0: memref<2x256xbf16, #tpu.memory_space<vmem>>, %arg1: memref<256x64xbf16, #tpu.memory_space<vmem>>, %arg2: memref<1x64xf32, #tpu.memory_space<vmem>>, %arg3: memref<64x16xbf16, #tpu.memory_space<vmem>>, %arg4: memref<1x16xf32, #tpu.memory_space<vmem>>, %arg5: memref<16x10xbf16, #tpu.memory_space<vmem>>, %arg6: memref<1x10xf32, #tpu.memory_space<vmem>>, %arg7: memref<2x10xf32, #tpu.memory_space<vmem>>) attributes {dimension_semantics = [], scalar_prefetch = 0 : i64, scratch_operands = 0 : i64, tpu.core_type = #tpu.core_type<tc>} {
    %c0 = arith.constant 0 : index
    %c0_0 = arith.constant 0 : index
    %0 = vector.load %arg0[%c0, %c0_0] : memref<2x256xbf16, #tpu.memory_space<vmem>>, vector<2x256xbf16>
    %c0_1 = arith.constant 0 : index
    %c0_2 = arith.constant 0 : index
    %1 = vector.load %arg1[%c0_1, %c0_2] : memref<256x64xbf16, #tpu.memory_space<vmem>>, vector<256x64xbf16>
    %cst = arith.constant dense<0.000000e+00> : vector<2x64xf32>
    %2 = tpu.matmul %0, %1, %cst {dimension_numbers = #tpu.dot_dimension_numbers<[1], [0], [0], [1], [0, 0, 1, 1], [], []>} : vector<2x256xbf16>, vector<256x64xbf16>, vector<2x64xf32> -> vector<2x64xf32>
    %c0_3 = arith.constant 0 : index
    %c0_4 = arith.constant 0 : index
    %3 = vector.load %arg2[%c0_3, %c0_4] : memref<1x64xf32, #tpu.memory_space<vmem>>, vector<1x64xf32>
    %4 = vector.broadcast %3 : vector<1x64xf32> to vector<2x64xf32>
    %5 = arith.addf %2, %4 : vector<2x64xf32>
    %cst_5 = arith.constant 0.000000e+00 : f32
    %6 = vector.broadcast %cst_5 : f32 to vector<2x64xf32>
    %7 = arith.maximumf %5, %6 : vector<2x64xf32>
    %8 = arith.truncf %7 : vector<2x64xf32> to vector<2x64xbf16>
    %c0_6 = arith.constant 0 : index
    %c0_7 = arith.constant 0 : index
    %9 = vector.load %arg3[%c0_6, %c0_7] : memref<64x16xbf16, #tpu.memory_space<vmem>>, vector<64x16xbf16>
    %cst_8 = arith.constant dense<0.000000e+00> : vector<2x16xf32>
    %10 = tpu.matmul %8, %9, %cst_8 {dimension_numbers = #tpu.dot_dimension_numbers<[1], [0], [0], [1], [0, 0, 1, 1], [], []>} : vector<2x64xbf16>, vector<64x16xbf16>, vector<2x16xf32> -> vector<2x16xf32>
    %c0_9 = arith.constant 0 : index
    %c0_10 = arith.constant 0 : index
    %11 = vector.load %arg4[%c0_9, %c0_10] : memref<1x16xf32, #tpu.memory_space<vmem>>, vector<1x16xf32>
    %12 = vector.broadcast %11 : vector<1x16xf32> to vector<2x16xf32>
    %13 = arith.addf %10, %12 : vector<2x16xf32>
    %cst_11 = arith.constant 0.000000e+00 : f32
    %14 = vector.broadcast %cst_11 : f32 to vector<2x16xf32>
    %15 = arith.maximumf %13, %14 : vector<2x16xf32>
    %16 = arith.truncf %15 : vector<2x16xf32> to vector<2x16xbf16>
    %c0_12 = arith.constant 0 : index
    %c0_13 = arith.constant 0 : index
    %17 = vector.load %arg5[%c0_12, %c0_13] : memref<16x10xbf16, #tpu.memory_space<vmem>>, vector<16x10xbf16>
    %cst_14 = arith.constant dense<0.000000e+00> : vector<2x10xf32>
    %18 = tpu.matmul %16, %17, %cst_14 {dimension_numbers = #tpu.dot_dimension_numbers<[1], [0], [0], [1], [0, 0, 1, 1], [], []>} : vector<2x16xbf16>, vector<16x10xbf16>, vector<2x10xf32> -> vector<2x10xf32>
    %c0_15 = arith.constant 0 : index
    %c0_16 = arith.constant 0 : index
    %19 = vector.load %arg6[%c0_15, %c0_16] : memref<1x10xf32, #tpu.memory_space<vmem>>, vector<1x10xf32>
    %20 = vector.broadcast %19 : vector<1x10xf32> to vector<2x10xf32>
    %21 = arith.addf %18, %20 : vector<2x10xf32>
    %cst_17 = arith.constant dense<0xFF800000> : vector<2xf32>
    %22 = vector.multi_reduction <maximumf>, %21, %cst_17 [1] : vector<2x10xf32> to vector<2xf32>
    %23 = vector.shape_cast %22 : vector<2xf32> to vector<2x1xf32>
    %24 = vector.broadcast %23 : vector<2x1xf32> to vector<2x10xf32>
    %25 = arith.subf %21, %24 : vector<2x10xf32>
    %26 = math.exp %25 : vector<2x10xf32>
    %cst_18 = arith.constant dense<0.000000e+00> : vector<2xf32>
    %27 = vector.multi_reduction <add>, %26, %cst_18 [1] : vector<2x10xf32> to vector<2xf32>
    %28 = vector.shape_cast %27 : vector<2xf32> to vector<2x1xf32>
    %29 = tpu.reciprocal %28 {approx = true} : vector<2x1xf32> -> vector<2x1xf32>
    %30 = vector.broadcast %29 : vector<2x1xf32> to vector<2x10xf32>
    %31 = arith.mulf %26, %30 : vector<2x10xf32>
    %c0_19 = arith.constant 0 : index
    %c0_20 = arith.constant 0 : index
    %32 = vector.load %arg7[%c0_19, %c0_20] : memref<2x10xf32, #tpu.memory_space<vmem>>, vector<2x10xf32>
    tpu.vector_store %arg7[%c0_19, %c0_20], %31 {strides = array<i32>} : memref<2x10xf32, #tpu.memory_space<vmem>>, vector<2x10xf32>,
    return
  }
}

</mosaic_0001>

<bundles_post_ra>
// kernel: hpsearchnet_forward.4
= control target key start
LH: loop header
LB: loop body
LE: loop exit
PB: predicated region body
PF: predicated region fallthrough
CT: control target
= control target key end

     0   :  { %vm347_vm0 = vcmask 1043456   ;;  %vm348_vm1 = vcmask 1044480   ;;  %v920_v2 = vmov 65535   ;;  %vm250_vm2 = vcmask 72704   ;;  %s1168_s1 = inlined_call_operand.vmem [shape: bf16[9,128], index: 1, kind: input, shape index: {}]   ;;  %s1169_s0 = inlined_call_operand.vmem [shape: bf16[512,9], index: 0, kind: input, shape index: {}]   ;;  %s1170_s2 = inlined_call_operand.vmem [shape: f32[1,128], index: 2, kind: input, shape index: {}]   ;;  %s1171_s3 = inlined_call_operand.vmem [shape: bf16[128,128], index: 3, kind: output, shape index: {}]  }
   0x1   :  { %v801_v0 = vld [vmem:[%s1168_s1] sm:$0xf]  ;;  %v867_v1 = vld [vmem:[%s1168_s1] sm:$0x10]  ;;  %v349_v3 = vsel %vm347_vm0, 4294967295, %v920_v2  ;;  %v836_v11 = vld [vmem:[%s1169_s0 + $0x8] sm:$0xff] }
   0x2   :  { %v802_v4 = vor.u32 %v867_v1, %v801_v0  ;;  %v350_v5 = vsel %vm348_vm1, %v349_v3, 0  ;;  %v835_v7 = vld [vmem:[%s1169_s0] sm:$0xff]  ;;  %v844_v12 = vld [vmem:[%s1169_s0 + $0x48] sm:$0xff]  ;;  %v837_v15 = vld [vmem:[%s1169_s0 + $0x10] sm:$0xff] }
   0x3   :  { %v843_v8 = vld [vmem:[%s1169_s0 + $0x40] sm:$0xff]  ;;  %v852_v13 = vld [vmem:[%s1169_s0 + $0x88] sm:$0xff]  ;;  %v845_v16 = vld [vmem:[%s1169_s0 + $0x50] sm:$0xff] }
   0x4   :  { %v352_v6 = vand.u32 %v802_v4, %v350_v5  ;;  %v851_v9 = vld [vmem:[%s1169_s0 + $0x80] sm:$0xff]  ;;  %v860_v14 = vld [vmem:[%s1169_s0 + $0xc8] sm:$0xff]  ;;  %v853_v17 = vld [vmem:[%s1169_s0 + $0x90] sm:$0xff] }
   0x5   :  { %v859_v10 = vld [vmem:[%s1169_s0 + $0xc0] sm:$0xff]  ;;  %v861_v18 = vld [vmem:[%s1169_s0 + $0xd0] sm:$0xff]  ;;  %v838_v19 = vld [vmem:[%s1169_s0 + $0x18] sm:$0xff] }
   0x6   :  { %361 = vmatpush.bf16.msra.mxu0 %v352_v6  ;;  %915 = vmatpush.bf16.msra.mxu1 %v352_v6  ;;  %v846_v20 = vld [vmem:[%s1169_s0 + $0x58] sm:$0xff]  ;;  %v839_v23 = vld [vmem:[%s1169_s0 + $0x20] sm:$0xff]  ;;  %v840_v27 = vld [vmem:[%s1169_s0 + $0x28] sm:$0xff] }
   0x7   :  { %916 = vmatpush.bf16.msra.mxu2 %v352_v6  ;;  %917 = vmatpush.bf16.msra.mxu3 %v352_v6  ;;  %v854_v21 = vld [vmem:[%s1169_s0 + $0x98] sm:$0xff]  ;;  %v847_v24 = vld [vmem:[%s1169_s0 + $0x60] sm:$0xff]  ;;  %v848_v28 = vld [vmem:[%s1169_s0 + $0x68] sm:$0xff] }
   0x8   :  { %v862_v22 = vld [vmem:[%s1169_s0 + $0xd8] sm:$0xff]  ;;  %v855_v25 = vld [vmem:[%s1169_s0 + $0xa0] sm:$0xff]  ;;  %v856_v29 = vld [vmem:[%s1169_s0 + $0xa8] sm:$0xff] }
   0x9   :  { %803 = vmatmul.msk.bf16.vlgmr.msra.gmra.mxu0 %vm250_vm2, %v835_v7  ;;  %811 = vmatmul.msk.bf16.vlgmr.msra.gmra.mxu1 %vm250_vm2, %v843_v8  ;;  %v863_v26 = vld [vmem:[%s1169_s0 + $0xe0] sm:$0xff]  ;;  %v864_v30 = vld [vmem:[%s1169_s0 + $0xe8] sm:$0xff]  ;;  %v841_v31 = vld [vmem:[%s1169_s0 + $0x30] sm:$0xff] }
   0xa   :  { %819 = vmatmul.msk.bf16.vlgmr.msra.gmra.mxu2 %vm250_vm2, %v851_v9  ;;  %827 = vmatmul.msk.bf16.vlgmr.msra.gmra.mxu3 %vm250_vm2, %v859_v10  ;;  %v849_v32 = vld [vmem:[%s1169_s0 + $0x70] sm:$0xff]  ;;  %v842_v35 = vld [vmem:[%s1169_s0 + $0x38] sm:$0xff]  ;;  %v1078_v41 = vld [vmem:[%s1170_s2] ss:$0 sm:$0xff] }
   0xb   :  { %v857_v33 = vld [vmem:[%s1169_s0 + $0xb0] sm:$0xff]  ;;  %v850_v36 = vld [vmem:[%s1169_s0 + $0x78] sm:$0xff] }
   0xc   :  { %v865_v34 = vld [vmem:[%s1169_s0 + $0xf0] sm:$0xff]  ;;  %v858_v37 = vld [vmem:[%s1169_s0 + $0xb8] sm:$0xff] }
   0xd   :  { %v866_v38 = vld [vmem:[%s1169_s0 + $0xf8] sm:$0xff] }
  0x19   :  { %804 = vmatmul.msk.bf16.gmra.mxu0 %vm250_vm2, %v836_v11  ;;  %812 = vmatmul.msk.bf16.gmra.mxu1 %vm250_vm2, %v844_v12 }
  0x1a   :  { %820 = vmatmul.msk.bf16.gmra.mxu2 %vm250_vm2, %v852_v13  ;;  %828 = vmatmul.msk.bf16.gmra.mxu3 %vm250_vm2, %v860_v14 }
  0x29   :  { %805 = vmatmul.msk.bf16.gmra.mxu0 %vm250_vm2, %v837_v15  ;;  %813 = vmatmul.msk.bf16.gmra.mxu1 %vm250_vm2, %v845_v16 }
  0x2a   :  { %821 = vmatmul.msk.bf16.gmra.mxu2 %vm250_vm2, %v853_v17  ;;  %829 = vmatmul.msk.bf16.gmra.mxu3 %vm250_vm2, %v861_v18 }
  0x39   :  { %806 = vmatmul.msk.bf16.gmra.mxu0 %vm250_vm2, %v838_v19  ;;  %814 = vmatmul.msk.bf16.gmra.mxu1 %vm250_vm2, %v846_v20 }
  0x3a   :  { %822 = vmatmul.msk.bf16.gmra.mxu2 %vm250_vm2, %v854_v21  ;;  %830 = vmatmul.msk.bf16.gmra.mxu3 %vm250_vm2, %v862_v22 }
  0x49   :  { %807 = vmatmul.msk.bf16.gmra.mxu0 %vm250_vm2, %v839_v23  ;;  %815 = vmatmul.msk.bf16.gmra.mxu1 %vm250_vm2, %v847_v24 }
  0x4a   :  { %823 = vmatmul.msk.bf16.gmra.mxu2 %vm250_vm2, %v855_v25  ;;  %831 = vmatmul.msk.bf16.gmra.mxu3 %vm250_vm2, %v863_v26 }
  0x59   :  { %808 = vmatmul.msk.bf16.gmra.mxu0 %vm250_vm2, %v840_v27  ;;  %816 = vmatmul.msk.bf16.gmra.mxu1 %vm250_vm2, %v848_v28 }
  0x5a   :  { %824 = vmatmul.msk.bf16.gmra.mxu2 %vm250_vm2, %v856_v29  ;;  %832 = vmatmul.msk.bf16.gmra.mxu3 %vm250_vm2, %v864_v30 }
  0x69   :  { %809 = vmatmul.msk.bf16.gmra.mxu0 %vm250_vm2, %v841_v31  ;;  %817 = vmatmul.msk.bf16.gmra.mxu1 %vm250_vm2, %v849_v32 }
  0x6a   :  { %825 = vmatmul.msk.bf16.gmra.mxu2 %vm250_vm2, %v857_v33  ;;  %833 = vmatmul.msk.bf16.gmra.mxu3 %vm250_vm2, %v865_v34 }
  0x79   :  { %810 = vmatmul.msk.bf16.gmra.mxu0 %vm250_vm2, %v842_v35  ;;  %818 = vmatmul.msk.bf16.gmra.mxu1 %vm250_vm2, %v850_v36 }
  0x7a   :  { %826 = vmatmul.msk.bf16.gmra.mxu2 %vm250_vm2, %v858_v37  ;;  %834 = vmatmul.msk.bf16.gmra.mxu3 %vm250_vm2, %v866_v38 }
  0x86   :  { %v363_v39 = vpop.f32.mrf.mxu0  ;;  %v403_v40 = vpop.f32.mrf.mxu1 }
  0x87   :  { %v364_v46 = vadd.f32 %v1078_v41, %v363_v39  ;;  %v404_v47 = vadd.f32 %v1078_v41, %v403_v40 }
  0x89   :  { %v523_v52 = vmax.f32 %v364_v46, 0.0  ;;  %v539_v53 = vmax.f32 %v404_v47, 0.0 }
  0x8b   :  { %v587_v0 = vmax.f32 %v523_v52, %v539_v53 }
  0x8d   :  { %v443_v42 = vpop.f32.mrf.mxu2  ;;  %v483_v43 = vpop.f32.mrf.mxu3 }
  0x8e   :  { %v365_v44 = vpop.f32.mrf.mxu0  ;;  %v405_v45 = vpop.f32.mrf.mxu1  ;;  %v444_v48 = vadd.f32 %v1078_v41, %v443_v42  ;;  %v484_v49 = vadd.f32 %v1078_v41, %v483_v43 }
  0x8f   :  { %v366_v50 = vadd.f32 %v1078_v41, %v365_v44  ;;  %v406_v51 = vadd.f32 %v1078_v41, %v405_v45 }
  0x90   :  { %v555_v54 = vmax.f32 %v444_v48, 0.0  ;;  %v571_v55 = vmax.f32 %v484_v49, 0.0 }
  0x91   :  { %v524_v58 = vmax.f32 %v366_v50, 0.0  ;;  %v540_v59 = vmax.f32 %v406_v51, 0.0 }
  0x92   :  { %v603_v1 = vmax.f32 %v555_v54, %v571_v55 }
  0x93   :  { %v588_v4 = vmax.f32 %v524_v58, %v540_v59 }
  0x94   :  { %v619_v6 = vmax.f32 %v587_v0, %v603_v1 }
  0x95   :  { %v445_v56 = vpop.f32.mrf.mxu2  ;;  %v485_v57 = vpop.f32.mrf.mxu3 }
  0x96   :  { %v446_v60 = vadd.f32 %v1078_v41, %v445_v56  ;;  %v486_v61 = vadd.f32 %v1078_v41, %v485_v57  ;;  %v368_v62 = vpop.f32.mrf.mxu0  ;;  %v408_v63 = vpop.f32.mrf.mxu1 }
  0x97   :  { %v369_v13 = vadd.f32 %v1078_v41, %v368_v62  ;;  %v409_v14 = vadd.f32 %v1078_v41, %v408_v63 }
  0x98   :  { %v556_v2 = vmax.f32 %v446_v60, 0.0  ;;  %v572_v3 = vmax.f32 %v486_v61, 0.0 }
  0x99   :  { %v525_v19 = vmax.f32 %v369_v13, 0.0  ;;  %v541_v20 = vmax.f32 %v409_v14, 0.0 }
  0x9a   :  { %v604_v5 = vmax.f32 %v556_v2, %v572_v3 }
  0x9b   :  { %v589_v31 = vmax.f32 %v525_v19, %v541_v20 }
  0x9c   :  { %v620_v7 = vmax.f32 %v588_v4, %v604_v5 }
  0x9d   :  { %v448_v8 = vpop.f32.mrf.mxu2  ;;  %v488_v9 = vpop.f32.mrf.mxu3 }
  0x9e   :  { %v871_v10 = vpack.c.bf16 %v620_v7, %v619_v6  ;;  %v370_v11 = vpop.f32.mrf.mxu0  ;;  %v410_v12 = vpop.f32.mrf.mxu1  ;;  %v449_v15 = vadd.f32 %v1078_v41, %v448_v8  ;;  %v489_v16 = vadd.f32 %v1078_v41, %v488_v9 }
  0x9f   :  { %v371_v17 = vadd.f32 %v1078_v41, %v370_v11  ;;  %v411_v18 = vadd.f32 %v1078_v41, %v410_v12 }
  0xa0   :  { %872 = vst [vmem:[%s1171_s3] sm:$0xff] %v871_v10   ;;  %v557_v21 = vmax.f32 %v449_v15, 0.0  ;;  %v573_v22 = vmax.f32 %v489_v16, 0.0 }
  0xa1   :  { %v526_v25 = vmax.f32 %v371_v17, 0.0  ;;  %v542_v26 = vmax.f32 %v411_v18, 0.0 }
  0xa2   :  { %v605_v32 = vmax.f32 %v557_v21, %v573_v22 }
  0xa3   :  { %v590_v35 = vmax.f32 %v526_v25, %v542_v26 }
  0xa4   :  { %v621_v37 = vmax.f32 %v589_v31, %v605_v32 }
  0xa5   :  { %v450_v23 = vpop.f32.mrf.mxu2  ;;  %v490_v24 = vpop.f32.mrf.mxu3 }
  0xa6   :  { %v451_v27 = vadd.f32 %v1078_v41, %v450_v23  ;;  %v491_v28 = vadd.f32 %v1078_v41, %v490_v24  ;;  %v373_v29 = vpop.f32.mrf.mxu0  ;;  %v413_v30 = vpop.f32.mrf.mxu1 }
  0xa7   :  { %v374_v45 = vadd.f32 %v1078_v41, %v373_v29  ;;  %v414_v46 = vadd.f32 %v1078_v41, %v413_v30 }
  0xa8   :  { %v558_v33 = vmax.f32 %v451_v27, 0.0  ;;  %v574_v34 = vmax.f32 %v491_v28, 0.0 }
  0xa9   :  { %v527_v51 = vmax.f32 %v374_v45, 0.0  ;;  %v543_v52 = vmax.f32 %v414_v46, 0.0 }
  0xaa   :  { %v606_v36 = vmax.f32 %v558_v33, %v574_v34 }
  0xab   :  { %v591_v63 = vmax.f32 %v527_v51, %v543_v52 }
  0xac   :  { %v622_v38 = vmax.f32 %v590_v35, %v606_v36 }
  0xad   :  { %v453_v39 = vpop.f32.mrf.mxu2  ;;  %v493_v40 = vpop.f32.mrf.mxu3 }
  0xae   :  { %v876_v42 = vpack.c.bf16 %v622_v38, %v621_v37  ;;  %v375_v43 = vpop.f32.mrf.mxu0  ;;  %v415_v44 = vpop.f32.mrf.mxu1  ;;  %v454_v47 = vadd.f32 %v1078_v41, %v453_v39  ;;  %v494_v48 = vadd.f32 %v1078_v41, %v493_v40 }
  0xaf   :  { %v376_v49 = vadd.f32 %v1078_v41, %v375_v43  ;;  %v416_v50 = vadd.f32 %v1078_v41, %v415_v44 }
  0xb0   :  { %908 = vst [vmem:[%s1171_s3 + $0x8] sm:$0xff] %v876_v42   ;;  %v559_v53 = vmax.f32 %v454_v47, 0.0  ;;  %v575_v54 = vmax.f32 %v494_v48, 0.0 }
  0xb1   :  { %v528_v57 = vmax.f32 %v376_v49, 0.0  ;;  %v544_v58 = vmax.f32 %v416_v50, 0.0 }
  0xb2   :  { %v607_v0 = vmax.f32 %v559_v53, %v575_v54 }
  0xb3   :  { %v592_v3 = vmax.f32 %v528_v57, %v544_v58 }
  0xb4   :  { %v623_v5 = vmax.f32 %v591_v63, %v607_v0 }
  0xb5   :  { %v455_v55 = vpop.f32.mrf.mxu2  ;;  %v495_v56 = vpop.f32.mrf.mxu3 }
  0xb6   :  { %v456_v59 = vadd.f32 %v1078_v41, %v455_v55  ;;  %v496_v60 = vadd.f32 %v1078_v41, %v495_v56  ;;  %v378_v61 = vpop.f32.mrf.mxu0  ;;  %v418_v62 = vpop.f32.mrf.mxu1 }
  0xb7   :  { %v379_v12 = vadd.f32 %v1078_v41, %v378_v61  ;;  %v419_v13 = vadd.f32 %v1078_v41, %v418_v62 }
  0xb8   :  { %v560_v1 = vmax.f32 %v456_v59, 0.0  ;;  %v576_v2 = vmax.f32 %v496_v60, 0.0 }
  0xb9   :  { %v529_v18 = vmax.f32 %v379_v12, 0.0  ;;  %v545_v19 = vmax.f32 %v419_v13, 0.0 }
  0xba   :  { %v608_v4 = vmax.f32 %v560_v1, %v576_v2 }
  0xbb   :  { %v593_v30 = vmax.f32 %v529_v18, %v545_v19 }
  0xbc   :  { %v624_v6 = vmax.f32 %v592_v3, %v608_v4 }
  0xbd   :  { %v458_v7 = vpop.f32.mrf.mxu2  ;;  %v498_v8 = vpop.f32.mrf.mxu3 }
  0xbe   :  { %v881_v9 = vpack.c.bf16 %v624_v6, %v623_v5  ;;  %v380_v10 = vpop.f32.mrf.mxu0  ;;  %v420_v11 = vpop.f32.mrf.mxu1  ;;  %v459_v14 = vadd.f32 %v1078_v41, %v458_v7  ;;  %v499_v15 = vadd.f32 %v1078_v41, %v498_v8 }
  0xbf   :  { %v381_v16 = vadd.f32 %v1078_v41, %v380_v10  ;;  %v421_v17 = vadd.f32 %v1078_v41, %v420_v11 }
  0xc0   :  { %909 = vst [vmem:[%s1171_s3 + $0x10] sm:$0xff] %v881_v9   ;;  %v561_v20 = vmax.f32 %v459_v14, 0.0  ;;  %v577_v21 = vmax.f32 %v499_v15, 0.0 }
  0xc1   :  { %v530_v24 = vmax.f32 %v381_v16, 0.0  ;;  %v546_v25 = vmax.f32 %v421_v17, 0.0 }
  0xc2   :  { %v609_v31 = vmax.f32 %v561_v20, %v577_v21 }
  0xc3   :  { %v594_v34 = vmax.f32 %v530_v24, %v546_v25 }
  0xc4   :  { %v625_v36 = vmax.f32 %v593_v30, %v609_v31 }
  0xc5   :  { %v460_v22 = vpop.f32.mrf.mxu2  ;;  %v500_v23 = vpop.f32.mrf.mxu3 }
  0xc6   :  { %v461_v26 = vadd.f32 %v1078_v41, %v460_v22  ;;  %v501_v27 = vadd.f32 %v1078_v41, %v500_v23  ;;  %v383_v28 = vpop.f32.mrf.mxu0  ;;  %v423_v29 = vpop.f32.mrf.mxu1 }
  0xc7   :  { %v384_v44 = vadd.f32 %v1078_v41, %v383_v28  ;;  %v424_v45 = vadd.f32 %v1078_v41, %v423_v29 }
  0xc8   :  { %v562_v32 = vmax.f32 %v461_v26, 0.0  ;;  %v578_v33 = vmax.f32 %v501_v27, 0.0 }
  0xc9   :  { %v531_v50 = vmax.f32 %v384_v44, 0.0  ;;  %v547_v51 = vmax.f32 %v424_v45, 0.0 }
  0xca   :  { %v610_v35 = vmax.f32 %v562_v32, %v578_v33 }
  0xcb   :  { %v595_v62 = vmax.f32 %v531_v50, %v547_v51 }
  0xcc   :  { %v626_v37 = vmax.f32 %v594_v34, %v610_v35 }
  0xcd   :  { %v463_v38 = vpop.f32.mrf.mxu2  ;;  %v503_v39 = vpop.f32.mrf.mxu3 }
  0xce   :  { %v886_v40 = vpack.c.bf16 %v626_v37, %v625_v36  ;;  %v385_v42 = vpop.f32.mrf.mxu0  ;;  %v425_v43 = vpop.f32.mrf.mxu1  ;;  %v464_v46 = vadd.f32 %v1078_v41, %v463_v38  ;;  %v504_v47 = vadd.f32 %v1078_v41, %v503_v39 }
  0xcf   :  { %v386_v48 = vadd.f32 %v1078_v41, %v385_v42  ;;  %v426_v49 = vadd.f32 %v1078_v41, %v425_v43 }
  0xd0   :  { %910 = vst [vmem:[%s1171_s3 + $0x18] sm:$0xff] %v886_v40   ;;  %v563_v52 = vmax.f32 %v464_v46, 0.0  ;;  %v579_v53 = vmax.f32 %v504_v47, 0.0 }
  0xd1   :  { %v532_v56 = vmax.f32 %v386_v48, 0.0  ;;  %v548_v57 = vmax.f32 %v426_v49, 0.0 }
  0xd2   :  { %v611_v63 = vmax.f32 %v563_v52, %v579_v53 }
  0xd3   :  { %v596_v2 = vmax.f32 %v532_v56, %v548_v57 }
  0xd4   :  { %v627_v4 = vmax.f32 %v595_v62, %v611_v63 }
  0xd5   :  { %v465_v54 = vpop.f32.mrf.mxu2  ;;  %v505_v55 = vpop.f32.mrf.mxu3 }
  0xd6   :  { %v466_v58 = vadd.f32 %v1078_v41, %v465_v54  ;;  %v506_v59 = vadd.f32 %v1078_v41, %v505_v55  ;;  %v388_v60 = vpop.f32.mrf.mxu0  ;;  %v428_v61 = vpop.f32.mrf.mxu1 }
  0xd7   :  { %v389_v11 = vadd.f32 %v1078_v41, %v388_v60  ;;  %v429_v12 = vadd.f32 %v1078_v41, %v428_v61 }
  0xd8   :  { %v564_v0 = vmax.f32 %v466_v58, 0.0  ;;  %v580_v1 = vmax.f32 %v506_v59, 0.0 }
  0xd9   :  { %v533_v17 = vmax.f32 %v389_v11, 0.0  ;;  %v549_v18 = vmax.f32 %v429_v12, 0.0 }
  0xda   :  { %v612_v3 = vmax.f32 %v564_v0, %v580_v1 }
  0xdb   :  { %v597_v29 = vmax.f32 %v533_v17, %v549_v18 }
  0xdc   :  { %v628_v5 = vmax.f32 %v596_v2, %v612_v3 }
  0xdd   :  { %v468_v6 = vpop.f32.mrf.mxu2  ;;  %v508_v7 = vpop.f32.mrf.mxu3 }
  0xde   :  { %v891_v8 = vpack.c.bf16 %v628_v5, %v627_v4  ;;  %v390_v9 = vpop.f32.mrf.mxu0  ;;  %v430_v10 = vpop.f32.mrf.mxu1  ;;  %v469_v13 = vadd.f32 %v1078_v41, %v468_v6  ;;  %v509_v14 = vadd.f32 %v1078_v41, %v508_v7 }
  0xdf   :  { %v391_v15 = vadd.f32 %v1078_v41, %v390_v9  ;;  %v431_v16 = vadd.f32 %v1078_v41, %v430_v10 }
  0xe0   :  { %911 = vst [vmem:[%s1171_s3 + $0x20] sm:$0xff] %v891_v8   ;;  %v565_v19 = vmax.f32 %v469_v13, 0.0  ;;  %v581_v20 = vmax.f32 %v509_v14, 0.0 }
  0xe1   :  { %v534_v23 = vmax.f32 %v391_v15, 0.0  ;;  %v550_v24 = vmax.f32 %v431_v16, 0.0 }
  0xe2   :  { %v613_v30 = vmax.f32 %v565_v19, %v581_v20 }
  0xe3   :  { %v598_v33 = vmax.f32 %v534_v23, %v550_v24 }
  0xe4   :  { %v629_v35 = vmax.f32 %v597_v29, %v613_v30 }
  0xe5   :  { %v470_v21 = vpop.f32.mrf.mxu2  ;;  %v510_v22 = vpop.f32.mrf.mxu3 }
  0xe6   :  { %v471_v25 = vadd.f32 %v1078_v41, %v470_v21  ;;  %v511_v26 = vadd.f32 %v1078_v41, %v510_v22  ;;  %v393_v27 = vpop.f32.mrf.mxu0  ;;  %v433_v28 = vpop.f32.mrf.mxu1 }
  0xe7   :  { %v394_v43 = vadd.f32 %v1078_v41, %v393_v27  ;;  %v434_v44 = vadd.f32 %v1078_v41, %v433_v28 }
  0xe8   :  { %v566_v31 = vmax.f32 %v471_v25, 0.0  ;;  %v582_v32 = vmax.f32 %v511_v26, 0.0 }
  0xe9   :  { %v535_v49 = vmax.f32 %v394_v43, 0.0  ;;  %v551_v50 = vmax.f32 %v434_v44, 0.0 }
  0xea   :  { %v614_v34 = vmax.f32 %v566_v31, %v582_v32 }
  0xeb   :  { %v599_v61 = vmax.f32 %v535_v49, %v551_v50 }
  0xec   :  { %v630_v36 = vmax.f32 %v598_v33, %v614_v34 }
  0xed   :  { %v473_v37 = vpop.f32.mrf.mxu2  ;;  %v513_v38 = vpop.f32.mrf.mxu3 }
  0xee   :  { %v896_v39 = vpack.c.bf16 %v630_v36, %v629_v35  ;;  %v395_v40 = vpop.f32.mrf.mxu0  ;;  %v435_v42 = vpop.f32.mrf.mxu1  ;;  %v474_v45 = vadd.f32 %v1078_v41, %v473_v37  ;;  %v514_v46 = vadd.f32 %v1078_v41, %v513_v38 }
  0xef   :  { %v396_v47 = vadd.f32 %v1078_v41, %v395_v40  ;;  %v436_v48 = vadd.f32 %v1078_v41, %v435_v42 }
  0xf0   :  { %912 = vst [vmem:[%s1171_s3 + $0x28] sm:$0xff] %v896_v39   ;;  %v567_v51 = vmax.f32 %v474_v45, 0.0  ;;  %v583_v52 = vmax.f32 %v514_v46, 0.0 }
  0xf1   :  { %v536_v55 = vmax.f32 %v396_v47, 0.0  ;;  %v552_v56 = vmax.f32 %v436_v48, 0.0 }
  0xf2   :  { %v615_v62 = vmax.f32 %v567_v51, %v583_v52 }
  0xf3   :  { %v600_v1 = vmax.f32 %v536_v55, %v552_v56 }
  0xf4   :  { %v631_v3 = vmax.f32 %v599_v61, %v615_v62 }
  0xf5   :  { %v475_v53 = vpop.f32.mrf.mxu2  ;;  %v515_v54 = vpop.f32.mrf.mxu3 }
  0xf6   :  { %v476_v57 = vadd.f32 %v1078_v41, %v475_v53  ;;  %v516_v58 = vadd.f32 %v1078_v41, %v515_v54  ;;  %v398_v59 = vpop.f32.mrf.mxu0  ;;  %v438_v60 = vpop.f32.mrf.mxu1 }
  0xf7   :  { %v399_v10 = vadd.f32 %v1078_v41, %v398_v59  ;;  %v439_v11 = vadd.f32 %v1078_v41, %v438_v60 }
  0xf8   :  { %v568_v63 = vmax.f32 %v476_v57, 0.0  ;;  %v584_v0 = vmax.f32 %v516_v58, 0.0 }
  0xf9   :  { %v537_v16 = vmax.f32 %v399_v10, 0.0  ;;  %v553_v17 = vmax.f32 %v439_v11, 0.0 }
  0xfa   :  { %v616_v2 = vmax.f32 %v568_v63, %v584_v0 }
  0xfb   :  { %v601_v26 = vmax.f32 %v537_v16, %v553_v17 }
  0xfc   :  { %v632_v4 = vmax.f32 %v600_v1, %v616_v2 }
  0xfd   :  { %v478_v5 = vpop.f32.mrf.mxu2  ;;  %v518_v6 = vpop.f32.mrf.mxu3 }
  0xfe   :  { %v901_v7 = vpack.c.bf16 %v632_v4, %v631_v3  ;;  %v400_v8 = vpop.f32.mrf.mxu0  ;;  %v440_v9 = vpop.f32.mrf.mxu1  ;;  %v479_v12 = vadd.f32 %v1078_v41, %v478_v5  ;;  %v519_v13 = vadd.f32 %v1078_v41, %v518_v6 }
  0xff   :  { %v401_v14 = vadd.f32 %v1078_v41, %v400_v8  ;;  %v441_v15 = vadd.f32 %v1078_v41, %v440_v9 }
 0x100   :  { %913 = vst [vmem:[%s1171_s3 + $0x30] sm:$0xff] %v901_v7   ;;  %v569_v18 = vmax.f32 %v479_v12, 0.0  ;;  %v585_v19 = vmax.f32 %v519_v13, 0.0 }
 0x101   :  { %v538_v22 = vmax.f32 %v401_v14, 0.0  ;;  %v554_v23 = vmax.f32 %v441_v15, 0.0 }
 0x102   :  { %v617_v27 = vmax.f32 %v569_v18, %v585_v19 }
 0x103   :  { %v602_v30 = vmax.f32 %v538_v22, %v554_v23 }
 0x104   :  { %v633_v32 = vmax.f32 %v601_v26, %v617_v27 }
 0x105   :  { %v480_v20 = vpop.f32.mrf.mxu2  ;;  %v520_v21 = vpop.f32.mrf.mxu3 }
 0x106   :  { %v481_v24 = vadd.f32 %v1078_v41, %v480_v20  ;;  %v521_v25 = vadd.f32 %v1078_v41, %v520_v21 }
 0x108   :  { %v570_v28 = vmax.f32 %v481_v24, 0.0  ;;  %v586_v29 = vmax.f32 %v521_v25, 0.0 }
 0x10a   :  { %v618_v31 = vmax.f32 %v570_v28, %v586_v29 }
 0x10c   :  { %v634_v33 = vmax.f32 %v602_v30, %v618_v31 }
 0x10e   :  { %v906_v34 = vpack.c.bf16 %v634_v33, %v633_v32 }
 0x110   :  { %914 = vst [vmem:[%s1171_s3 + $0x38] sm:$0xff] %v906_v34  }

// kernel: hpsearchnet_forward.5
= control target key start
LH: loop header
LB: loop body
LE: loop exit
PB: predicated region body
PF: predicated region fallthrough
CT: control target
= control target key end

     0   :  { %vm179_vm0 = vcmask 130048   ;;  %s665_s1 = inlined_call_operand.vmem [shape: bf16[144,128], index: 1, kind: input, shape index: {}]   ;;  %s666_s0 = inlined_call_operand.vmem [shape: bf16[128,144], index: 0, kind: input, shape index: {}]   ;;  %s667_s2 = inlined_call_operand.vmem [shape: f32[1,128], index: 2, kind: input, shape index: {}]   ;;  %s668_s3 = inlined_call_operand.vmem [shape: bf16[32,128], index: 3, kind: output, shape index: {}]  }
   0x1   :  { %v473_v0 = vld [vmem:[%s665_s1 + $0x38] sm:$0xff]  ;;  %v474_v1 = vld [vmem:[%s665_s1 + $0x40] sm:$0xff]  ;;  %v346_v3 = vld [vmem:[%s666_s0 + $0x8] sm:$0xf0] }
   0x2   :  { %v450_v2 = vld [vmem:[%s666_s0 + $0x4] sm:$0xf]  ;;  %204 = vmatpush.bf16.msra.mxu0 %v473_v0  ;;  %486 = vmatpush.bf16.msra.mxu2 %v473_v0  ;;  %v472_v5 = vld [vmem:[%s665_s1 + $0x30] sm:$0xff]  ;;  %v471_v6 = vld [vmem:[%s665_s1 + $0x28] sm:$0xff] }
   0x3   :  { %v349_v4 = vor.u32 %v450_v2, %v346_v3  ;;  %260 = vmatpush.bf16.msra.mxu1 %v474_v1  ;;  %494 = vmatpush.bf16.msra.mxu3 %v474_v1  ;;  %v460_v7 = vld [vmem:[%s666_s0 + $0x54] sm:$0xf]  ;;  %v386_v8 = vld [vmem:[%s666_s0 + $0x58] sm:$0xf0]  ;;  %v470_v10 = vld [vmem:[%s665_s1 + $0x20] sm:$0xff] }
   0x4   :  { %v389_v9 = vor.u32 %v460_v7, %v386_v8  ;;  %v469_v11 = vld [vmem:[%s665_s1 + $0x18] sm:$0xff]  ;;  %v452_v12 = vld [vmem:[%s666_s0 + $0x14] sm:$0xf]  ;;  %v467_v16 = vld [vmem:[%s665_s1 + $0x8] sm:$0xff] }
   0x5   :  { %v354_v13 = vld [vmem:[%s666_s0 + $0x18] sm:$0xf0]  ;;  %v468_v15 = vld [vmem:[%s665_s1 + $0x10] sm:$0xff]  ;;  %v462_v17 = vld [vmem:[%s666_s0 + $0x64] sm:$0xf] }
   0x6   :  { %442 = vmatmul.msk.bf16.vlgmr.msra.gmra.mxu1 %vm179_vm0, %v349_v4  ;;  %205 = vmatpush.bf16.msra.mxu0 %v472_v5  ;;  %v357_v14 = vor.u32 %v452_v12, %v354_v13  ;;  %v394_v18 = vld [vmem:[%s666_s0 + $0x68] sm:$0xf0]  ;;  %v466_v20 = vld [vmem:[%s665_s1] sm:$0xff]  ;;  %v451_v22 = vld [vmem:[%s666_s0 + $0x4] sm:$0xf0] }
   0x7   :  { %487 = vmatpush.bf16.msra.mxu2 %v472_v5  ;;  %447 = vmatmul.msk.bf16.vlgmr.msra.gmra.mxu3 %vm179_vm0, %v389_v9  ;;  %v397_v19 = vor.u32 %v462_v17, %v394_v18  ;;  %v344_v21 = vld [vmem:[%s666_s0] sm:$0xf]  ;;  %v459_v24 = vld [vmem:[%s666_s0 + $0x44] sm:$0xf0]  ;;  %v454_v27 = vld [vmem:[%s666_s0 + $0x24] sm:$0xf] }
   0x8   :  { %v376_v23 = vld [vmem:[%s666_s0 + $0x40] sm:$0xf]  ;;  %v345_v25 = vor.u32 %v451_v22, %v344_v21  ;;  %v362_v28 = vld [vmem:[%s666_s0 + $0x28] sm:$0xf0]  ;;  %v464_v30 = vld [vmem:[%s666_s0 + $0x74] sm:$0xf] }
   0x9   :  { %v377_v26 = vor.u32 %v459_v24, %v376_v23  ;;  %v365_v29 = vor.u32 %v454_v27, %v362_v28  ;;  %v402_v31 = vld [vmem:[%s666_s0 + $0x78] sm:$0xf0]  ;;  %v352_v33 = vld [vmem:[%s666_s0 + $0x10] sm:$0xf]  ;;  %v453_v34 = vld [vmem:[%s666_s0 + $0x14] sm:$0xf0] }
   0xa   :  { %206 = vmatpush.bf16.msra.mxu0 %v471_v6  ;;  %v405_v32 = vor.u32 %v464_v30, %v402_v31  ;;  %v384_v35 = vld [vmem:[%s666_s0 + $0x50] sm:$0xf]  ;;  %v461_v36 = vld [vmem:[%s666_s0 + $0x54] sm:$0xf0]  ;;  %v353_v37 = vor.u32 %v453_v34, %v352_v33  ;;  %v456_v39 = vld [vmem:[%s666_s0 + $0x34] sm:$0xf] }
   0xb   :  { %488 = vmatpush.bf16.msra.mxu2 %v471_v6  ;;  %v385_v38 = vor.u32 %v461_v36, %v384_v35  ;;  %v370_v40 = vld [vmem:[%s666_s0 + $0x38] sm:$0xf0]  ;;  %v360_v42 = vld [vmem:[%s666_s0 + $0x20] sm:$0xf]  ;;  %v455_v43 = vld [vmem:[%s666_s0 + $0x24] sm:$0xf0] }
   0xc   :  { %v373_v41 = vor.u32 %v456_v39, %v370_v40  ;;  %v392_v44 = vld [vmem:[%s666_s0 + $0x60] sm:$0xf]  ;;  %v463_v45 = vld [vmem:[%s666_s0 + $0x64] sm:$0xf0]  ;;  %v361_v46 = vor.u32 %v455_v43, %v360_v42  ;;  %v458_v48 = vld [vmem:[%s666_s0 + $0x44] sm:$0xf] }
   0xd   :  { %v393_v47 = vor.u32 %v463_v45, %v392_v44  ;;  %v378_v49 = vld [vmem:[%s666_s0 + $0x48] sm:$0xf0]  ;;  %v368_v51 = vld [vmem:[%s666_s0 + $0x30] sm:$0xf]  ;;  %v457_v52 = vld [vmem:[%s666_s0 + $0x34] sm:$0xf0] }
   0xe   :  { %207 = vmatpush.bf16.msra.mxu0 %v470_v10  ;;  %v381_v50 = vor.u32 %v458_v48, %v378_v49  ;;  %v400_v53 = vld [vmem:[%s666_s0 + $0x70] sm:$0xf]  ;;  %v465_v54 = vld [vmem:[%s666_s0 + $0x74] sm:$0xf0]  ;;  %v369_v55 = vor.u32 %v457_v52, %v368_v51 }
   0xf   :  { %489 = vmatpush.bf16.msra.mxu2 %v470_v10  ;;  %v401_v56 = vor.u32 %v465_v54, %v400_v53 }
  0x12   :  { %208 = vmatpush.bf16.msra.mxu0 %v469_v11 }
  0x13   :  { %490 = vmatpush.bf16.msra.mxu2 %v469_v11 }
  0x16   :  { %443 = vmatmul.msk.bf16.gmra.mxu1 %vm179_vm0, %v357_v14  ;;  %209 = vmatpush.bf16.msra.mxu0 %v468_v15  ;;  %v495_v14 = vld [vmem:[%s667_s2] ss:$0 sm:$0xff] }
  0x17   :  { %491 = vmatpush.bf16.msra.mxu2 %v468_v15  ;;  %448 = vmatmul.msk.bf16.gmra.mxu3 %vm179_vm0, %v397_v19 }
  0x1a   :  { %210 = vmatpush.bf16.msra.mxu0 %v467_v16 }
  0x1b   :  { %492 = vmatpush.bf16.msra.mxu2 %v467_v16 }
  0x1e   :  { %211 = vmatpush.bf16.msra.mxu0 %v466_v20 }
  0x1f   :  { %493 = vmatpush.bf16.msra.mxu2 %v466_v20 }
  0x21   :  { %212 = vmatmul.bf16.vlgmr.msra.gmra.mxu0 %v345_v25 }
  0x22   :  { %232 = vmatmul.bf16.vlgmr.msra.gmra.mxu2 %v377_v26 }
  0x26   :  { %444 = vmatmul.msk.bf16.gmra.mxu1 %vm179_vm0, %v365_v29 }
  0x27   :  { %449 = vmatmul.msk.bf16.gmra.mxu3 %vm179_vm0, %v405_v32 }
  0x31   :  { %217 = vmatmul.bf16.gmra.mxu0 %v353_v37 }
  0x32   :  { %237 = vmatmul.bf16.gmra.mxu2 %v385_v38 }
  0x36   :  { %445 = vmatmul.msk.bf16.gmra.mxu1 %vm179_vm0, %v373_v41 }
  0x41   :  { %222 = vmatmul.bf16.gmra.mxu0 %v361_v46 }
  0x42   :  { %242 = vmatmul.bf16.gmra.mxu2 %v393_v47 }
  0x46   :  { %446 = vmatmul.msk.bf16.gmra.mxu1 %vm179_vm0, %v381_v50 }
  0x51   :  { %227 = vmatmul.bf16.gmra.mxu0 %v369_v55 }
  0x52   :  { %247 = vmatmul.bf16.gmra.mxu2 %v401_v56 }
  0x83   :  { %v262_v57 = vpop.f32.mrf.mxu1 }
  0x8a   :  { %v287_v3 = vpop.f32.mrf.mxu3 }
  0x8b   :  { %v264_v58 = vpop.f32.mrf.mxu1 }
  0x92   :  { %v651_v8 = vpop.f32.mrf.mxu3 }
  0x93   :  { %v647_v59 = vpop.f32.mrf.mxu1 }
  0x9a   :  { %v292_v12 = vpop.f32.mrf.mxu3 }
  0x9b   :  { %v649_v60 = vpop.f32.mrf.mxu1 }
  0x9e   :  { %v213_v61 = vpop.f32.mrf.mxu0 }
  0x9f   :  { %v214_v20 = vadd.f32 %v495_v14, %v213_v61 }
  0xa1   :  { %v263_v30 = vadd.f32 %v262_v57, %v214_v20 }
  0xa2   :  { %v294_v24 = vpop.f32.mrf.mxu3 }
  0xa3   :  { %v272_v62 = vpop.f32.mrf.mxu1  ;;  %v302_v41 = vmax.f32 %v263_v30, 0.0 }
  0xa5   :  { %v233_v63 = vpop.f32.mrf.mxu2 }
  0xa6   :  { %v215_v0 = vpop.f32.mrf.mxu0  ;;  %v234_v21 = vadd.f32 %v495_v14, %v233_v63 }
  0xa7   :  { %v216_v22 = vadd.f32 %v495_v14, %v215_v0 }
  0xa9   :  { %v265_v32 = vadd.f32 %v264_v58, %v216_v22 }
  0xaa   :  { %v297_v49 = vpop.f32.mrf.mxu3 }
  0xab   :  { %v274_v1 = vpop.f32.mrf.mxu1  ;;  %v303_v42 = vmax.f32 %v265_v32, 0.0 }
  0xad   :  { %v235_v2 = vpop.f32.mrf.mxu2 }
  0xae   :  { %v218_v4 = vpop.f32.mrf.mxu0  ;;  %v236_v26 = vadd.f32 %v495_v14, %v235_v2 }
  0xaf   :  { %v219_v61 = vadd.f32 %v495_v14, %v218_v4 }
  0xb2   :  { %v299_v4 = vpop.f32.mrf.mxu3 }
  0xb3   :  { %v277_v5 = vpop.f32.mrf.mxu1 }
  0xb5   :  { %v238_v6 = vpop.f32.mrf.mxu2 }
  0xb6   :  { %v220_v7 = vpop.f32.mrf.mxu0  ;;  %v239_v55 = vadd.f32 %v495_v14, %v238_v6 }
  0xbb   :  { %v279_v9 = vpop.f32.mrf.mxu1 }
  0xbd   :  { %v240_v10 = vpop.f32.mrf.mxu2 }
  0xbe   :  { %v223_v11 = vpop.f32.mrf.mxu0  ;;  %v241_v63 = vadd.f32 %v495_v14, %v240_v10 }
  0xbf   :  { %v224_v18 = vadd.f32 %v495_v14, %v223_v11 }
  0xc0   :  { %v290_v6 = vadd.f32 %v651_v8, %v241_v63 }
  0xc1   :  { %v273_v27 = vadd.f32 %v272_v62, %v224_v18  ;;  %v221_v62 = vadd.f32 %v495_v14, %v220_v7 }
  0xc2   :  { %v313_v22 = vmax.f32 %v290_v6, 0.0 }
  0xc3   :  { %v282_v13 = vpop.f32.mrf.mxu1  ;;  %v306_v37 = vmax.f32 %v273_v27, 0.0 }
  0xc4   :  { %v283_v28 = vadd.f32 %v282_v13, %v234_v21 }
  0xc5   :  { %v243_v15 = vpop.f32.mrf.mxu2  ;;  %v318_v46 = vmax.f32 %v302_v41, %v306_v37 }
  0xc6   :  { %v244_v16 = vadd.f32 %v495_v14, %v243_v15  ;;  %v225_v17 = vpop.f32.mrf.mxu0  ;;  %v310_v38 = vmax.f32 %v283_v28, 0.0  ;;  %v270_v15 = vadd.f32 %v649_v60, %v221_v62 }
  0xc7   :  { %v226_v19 = vadd.f32 %v495_v14, %v225_v17 }
  0xc8   :  { %v293_v23 = vadd.f32 %v292_v12, %v244_v16  ;;  %v268_v12 = vadd.f32 %v647_v59, %v219_v61  ;;  %v305_v21 = vmax.f32 %v270_v15, 0.0 }
  0xc9   :  { %v275_v29 = vadd.f32 %v274_v1, %v226_v19  ;;  %v288_v1 = vadd.f32 %v287_v3, %v239_v55 }
  0xca   :  { %v314_v33 = vmax.f32 %v293_v23, 0.0  ;;  %v304_v20 = vmax.f32 %v268_v12, 0.0 }
  0xcb   :  { %v284_v25 = vpop.f32.mrf.mxu1  ;;  %v307_v39 = vmax.f32 %v275_v29, 0.0  ;;  %v312_v7 = vmax.f32 %v288_v1, 0.0 }
  0xcc   :  { %v285_v34 = vadd.f32 %v284_v25, %v236_v26  ;;  %v322_v43 = vmax.f32 %v310_v38, %v314_v33 }
  0xcd   :  { %v245_v31 = vpop.f32.mrf.mxu2  ;;  %v319_v47 = vmax.f32 %v303_v42, %v307_v39 }
  0xce   :  { %v246_v35 = vadd.f32 %v495_v14, %v245_v31  ;;  %v228_v36 = vpop.f32.mrf.mxu0  ;;  %v311_v44 = vmax.f32 %v285_v34, 0.0  ;;  %v326_v51 = vmax.f32 %v318_v46, %v322_v43 }
  0xcf   :  { %v229_v57 = vadd.f32 %v495_v14, %v228_v36 }
  0xd0   :  { %v295_v40 = vadd.f32 %v294_v24, %v246_v35 }
  0xd1   :  { %v278_v2 = vadd.f32 %v277_v5, %v229_v57 }
  0xd2   :  { %v315_v45 = vmax.f32 %v295_v40, 0.0 }
  0xd3   :  { %v308_v10 = vmax.f32 %v278_v2, 0.0 }
  0xd4   :  { %v323_v48 = vmax.f32 %v311_v44, %v315_v45 }
  0xd5   :  { %v248_v50 = vpop.f32.mrf.mxu2 }
  0xd6   :  { %v327_v52 = vmax.f32 %v319_v47, %v323_v48  ;;  %v249_v53 = vadd.f32 %v495_v14, %v248_v50  ;;  %v230_v54 = vpop.f32.mrf.mxu0 }
  0xd7   :  { %v231_v58 = vadd.f32 %v495_v14, %v230_v54 }
  0xd8   :  { %v478_v56 = vpack.c.bf16 %v327_v52, %v326_v51  ;;  %v298_v0 = vadd.f32 %v297_v49, %v249_v53 }
  0xd9   :  { %v280_v11 = vadd.f32 %v279_v9, %v231_v58  ;;  %v320_v9 = vmax.f32 %v304_v20, %v308_v10 }
  0xda   :  { %479 = vst [vmem:[%s668_s3] sm:$0xff] %v478_v56   ;;  %v316_v16 = vmax.f32 %v298_v0, 0.0 }
  0xdb   :  { %v309_v18 = vmax.f32 %v280_v11, 0.0 }
  0xdc   :  { %v324_v3 = vmax.f32 %v312_v7, %v316_v16 }
  0xdd   :  { %v250_v13 = vpop.f32.mrf.mxu2  ;;  %v321_v23 = vmax.f32 %v305_v21, %v309_v18 }
  0xde   :  { %v251_v17 = vadd.f32 %v495_v14, %v250_v13  ;;  %v328_v24 = vmax.f32 %v320_v9, %v324_v3 }
  0xe0   :  { %v300_v19 = vadd.f32 %v299_v4, %v251_v17 }
  0xe2   :  { %v317_v5 = vmax.f32 %v300_v19, 0.0 }
  0xe4   :  { %v325_v59 = vmax.f32 %v313_v22, %v317_v5 }
  0xe6   :  { %v329_v25 = vmax.f32 %v321_v23, %v325_v59 }
  0xe8   :  { %v483_v60 = vpack.c.bf16 %v329_v25, %v328_v24 }
  0xea   :  { %485 = vst [vmem:[%s668_s3 + $0x8] sm:$0xff] %v483_v60  }

// kernel: hpsearchnet_forward.6
= control target key start
LH: loop header
LB: loop body
LE: loop exit
PB: predicated region body
PF: predicated region fallthrough
CT: control target
= control target key end

     0   :  { %vm201_vm0 = vcmask 261120   ;;  %s527_s1 = inlined_call_operand.vmem [shape: bf16[288,128], index: 1, kind: input, shape index: {}]   ;;  %s528_s0 = inlined_call_operand.vmem [shape: bf16[32,288], index: 0, kind: input, shape index: {}]   ;;  %s529_s2 = inlined_call_operand.vmem [shape: f32[1,128], index: 2, kind: input, shape index: {}]   ;;  %s530_s3 = inlined_call_operand.vmem [shape: bf16[8,128], index: 3, kind: output, shape index: {}]  }
   0x1   :  { %v389_v0 = vld [vmem:[%s527_s1 + $0x38] sm:$0xff]  ;;  %v388_v2 = vld [vmem:[%s527_s1 + $0x30] sm:$0xff]  ;;  %v399_v3 = vld [vmem:[%s527_s1 + $0x88] sm:$0xff] }
   0x2   :  { %v397_v1 = vld [vmem:[%s527_s1 + $0x78] sm:$0xff]  ;;  %208 = vmatpush.bf16.msra.mxu0 %v389_v0  ;;  %400 = vmatpush.bf16.msra.mxu3 %v389_v0  ;;  %v396_v4 = vld [vmem:[%s527_s1 + $0x70] sm:$0xff]  ;;  %v398_v5 = vld [vmem:[%s527_s1 + $0x80] sm:$0xff] }
   0x3   :  { %227 = vmatpush.bf16.msra.mxu1 %v397_v1  ;;  %252 = vmatpush.bf16.msra.mxu2 %v399_v3  ;;  %v288_v6 = vld [vmem:[%s528_s0 + $0x8] sm:$0xf]  ;;  %v378_v7 = vld [vmem:[%s528_s0 + $0x10] sm:$0xf0]  ;;  %v386_v11 = vld [vmem:[%s527_s1 + $0x20] sm:$0xff] }
   0x4   :  { %v387_v8 = vld [vmem:[%s527_s1 + $0x28] sm:$0xff]  ;;  %v289_v10 = vor.u32 %v378_v7, %v288_v6  ;;  %v394_v12 = vld [vmem:[%s527_s1 + $0x60] sm:$0xff]  ;;  %v385_v13 = vld [vmem:[%s527_s1 + $0x18] sm:$0xff] }
   0x5   :  { %v395_v9 = vld [vmem:[%s527_s1 + $0x68] sm:$0xff]  ;;  %v393_v14 = vld [vmem:[%s527_s1 + $0x58] sm:$0xff]  ;;  %v384_v15 = vld [vmem:[%s527_s1 + $0x10] sm:$0xff] }
   0x6   :  { %209 = vmatpush.bf16.msra.mxu0 %v388_v2  ;;  %401 = vmatpush.bf16.msra.mxu3 %v388_v2  ;;  %v392_v16 = vld [vmem:[%s527_s1 + $0x50] sm:$0xff]  ;;  %v300_v17 = vld [vmem:[%s528_s0 + $0x20] sm:$0xf]  ;;  %v381_v18 = vld [vmem:[%s528_s0 + $0x28] sm:$0xf0] }
   0x7   :  { %228 = vmatpush.bf16.msra.mxu1 %v396_v4  ;;  %253 = vmatpush.bf16.msra.mxu2 %v398_v5  ;;  %v383_v19 = vld [vmem:[%s527_s1 + $0x8] sm:$0xff]  ;;  %v301_v21 = vor.u32 %v381_v18, %v300_v17  ;;  %v382_v22 = vld [vmem:[%s527_s1] sm:$0xff]  ;;  %v292_v25 = vld [vmem:[%s528_s0 + $0x18] sm:$0xf] }
   0x8   :  { %v391_v20 = vld [vmem:[%s527_s1 + $0x48] sm:$0xff]  ;;  %v280_v23 = vld [vmem:[%s528_s0] sm:$0xf]  ;;  %v380_v26 = vld [vmem:[%s528_s0 + $0x20] sm:$0xf0] }
   0x9   :  { %v377_v24 = vld [vmem:[%s528_s0 + $0x8] sm:$0xf0]  ;;  %v390_v27 = vld [vmem:[%s527_s1 + $0x40] sm:$0xff]  ;;  %v282_v29 = vld [vmem:[%s528_s0 + $0xc] sm:$0xf0]  ;;  %v293_v31 = vor.u32 %v380_v26, %v292_v25 }
   0xa   :  { %210 = vmatpush.bf16.msra.mxu0 %v387_v8  ;;  %402 = vmatpush.bf16.msra.mxu3 %v387_v8  ;;  %v376_v28 = vld [vmem:[%s528_s0 + $0x4] sm:$0xf]  ;;  %v281_v30 = vor.u32 %v377_v24, %v280_v23  ;;  %v379_v33 = vld [vmem:[%s528_s0 + $0x1c] sm:$0xf]  ;;  %v294_v34 = vld [vmem:[%s528_s0 + $0x24] sm:$0xf0] }
   0xb   :  { %229 = vmatpush.bf16.msra.mxu1 %v395_v9  ;;  %374 = vmatmul.msk.bf16.vlgmr.msra.gmra.mxu2 %vm201_vm0, %v289_v10  ;;  %v285_v32 = vor.u32 %v376_v28, %v282_v29  ;;  %v297_v35 = vor.u32 %v379_v33, %v294_v34  ;;  %v408_v43 = vld [vmem:[%s529_s2] ss:$0 sm:$0xff] }
   0xe   :  { %211 = vmatpush.bf16.msra.mxu0 %v386_v11  ;;  %403 = vmatpush.bf16.msra.mxu3 %v386_v11 }
   0xf   :  { %230 = vmatpush.bf16.msra.mxu1 %v394_v12 }
  0x12   :  { %212 = vmatpush.bf16.msra.mxu0 %v385_v13  ;;  %404 = vmatpush.bf16.msra.mxu3 %v385_v13 }
  0x13   :  { %231 = vmatpush.bf16.msra.mxu1 %v393_v14 }
  0x16   :  { %213 = vmatpush.bf16.msra.mxu0 %v384_v15  ;;  %405 = vmatpush.bf16.msra.mxu3 %v384_v15 }
  0x17   :  { %232 = vmatpush.bf16.msra.mxu1 %v392_v16 }
  0x1a   :  { %214 = vmatpush.bf16.msra.mxu0 %v383_v19  ;;  %406 = vmatpush.bf16.msra.mxu3 %v383_v19 }
  0x1b   :  { %233 = vmatpush.bf16.msra.mxu1 %v391_v20  ;;  %375 = vmatmul.msk.bf16.gmra.mxu2 %vm201_vm0, %v301_v21 }
  0x1e   :  { %215 = vmatpush.bf16.msra.mxu0 %v382_v22  ;;  %407 = vmatpush.bf16.msra.mxu3 %v382_v22 }
  0x1f   :  { %234 = vmatpush.bf16.msra.mxu1 %v390_v27 }
  0x21   :  { %216 = vmatmul.bf16.vlgmr.msra.gmra.mxu0 %v281_v30  ;;  %221 = vmatmul.bf16.vlgmr.msra.gmra.mxu3 %v293_v31 }
  0x22   :  { %235 = vmatmul.bf16.vlgmr.msra.gmra.mxu1 %v285_v32 }
  0x32   :  { %240 = vmatmul.bf16.gmra.mxu1 %v297_v35 }
  0x8e   :  { %v255_v36 = vpop.f32.mrf.mxu2 }
  0x96   :  { %v257_v39 = vpop.f32.mrf.mxu2 }
  0x9e   :  { %v217_v38 = vpop.f32.mrf.mxu0  ;;  %v260_v45 = vpop.f32.mrf.mxu2 }
  0x9f   :  { %v236_v37 = vpop.f32.mrf.mxu1  ;;  %v218_v47 = vadd.f32 %v408_v43, %v217_v38 }
  0xa1   :  { %v237_v51 = vadd.f32 %v236_v37, %v218_v47 }
  0xa3   :  { %v256_v56 = vadd.f32 %v255_v36, %v237_v51 }
  0xa4   :  { %v222_v41 = vpop.f32.mrf.mxu3 }
  0xa5   :  { %v223_v48 = vadd.f32 %v408_v43, %v222_v41  ;;  %v265_v62 = vmax.f32 %v256_v56, 0.0 }
  0xa6   :  { %v219_v42 = vpop.f32.mrf.mxu0  ;;  %v262_v59 = vpop.f32.mrf.mxu2 }
  0xa7   :  { %v238_v40 = vpop.f32.mrf.mxu1  ;;  %v220_v44 = vadd.f32 %v408_v43, %v219_v42 }
  0xa9   :  { %v239_v49 = vadd.f32 %v238_v40, %v220_v44 }
  0xab   :  { %v258_v53 = vadd.f32 %v257_v39, %v239_v49 }
  0xac   :  { %v224_v50 = vpop.f32.mrf.mxu3 }
  0xad   :  { %v225_v54 = vadd.f32 %v408_v43, %v224_v50  ;;  %v266_v60 = vmax.f32 %v258_v53, 0.0 }
  0xaf   :  { %v241_v46 = vpop.f32.mrf.mxu1  ;;  %v269_v1 = vmax.f32 %v265_v62, %v266_v60 }
  0xb0   :  { %v242_v52 = vadd.f32 %v241_v46, %v223_v48 }
  0xb2   :  { %v261_v57 = vadd.f32 %v260_v45, %v242_v52 }
  0xb4   :  { %v267_v63 = vmax.f32 %v261_v57, 0.0 }
  0xb7   :  { %v243_v55 = vpop.f32.mrf.mxu1 }
  0xb8   :  { %v244_v58 = vadd.f32 %v243_v55, %v225_v54 }
  0xba   :  { %v263_v61 = vadd.f32 %v262_v59, %v244_v58 }
  0xbc   :  { %v268_v0 = vmax.f32 %v263_v61, 0.0 }
  0xbe   :  { %v270_v2 = vmax.f32 %v267_v63, %v268_v0 }
  0xc0   :  { %v271_v3 = vmax.f32 %v269_v1, %v270_v2 }
  0xc2   :  { %v272_v4 = vpack.c.bf16 %v271_v3, %v271_v3 }
  0xc4   :  { %273 = vst [vmem:[%s530_s3] sm:$0xf] %v272_v4 }

// kernel: hpsearchnet_forward.7
= control target key start
LH: loop header
LB: loop body
LE: loop exit
PB: predicated region body
PF: predicated region fallthrough
CT: control target
= control target key end

     0   :  { %s571_s0 = inlined_call_operand.vmem [shape: bf16[2,256], index: 0, kind: input, shape index: {}]   ;;  %s572_s1 = inlined_call_operand.vmem [shape: bf16[256,64], index: 1, kind: input, shape index: {}]   ;;  %s573_s2 = inlined_call_operand.vmem [shape: f32[1,64], index: 2, kind: input, shape index: {}]   ;;  %s574_s3 = inlined_call_operand.vmem [shape: bf16[64,16], index: 3, kind: input, shape index: {}]   ;;  %s575_s4 = inlined_call_operand.vmem [shape: f32[1,16], index: 4, kind: input, shape index: {}]   ;;  %s576_s5 = inlined_call_operand.vmem [shape: bf16[16,10], index: 5, kind: input, shape index: {}]   ;;  %s577_s6 = inlined_call_operand.vmem [shape: f32[1,10], index: 6, kind: input, shape index: {}]   ;;  %s578_s7 = inlined_call_operand.hbm [shape: f32[2,10], index: 7, kind: output, shape index: {}]  }
   0x1   :  { %v401_v0 = vld [vmem:[%s572_s1 + $0x38] sm:$0xff]  ;;  %v400_v2 = vld [vmem:[%s572_s1 + $0x30] sm:$0xff]  ;;  %v28_v4 = vld [vmem:[%s571_s0] sm:$0x3] }
   0x2   :  { %v409_v1 = vld [vmem:[%s572_s1 + $0x78] sm:$0xff]  ;;  %167 = vmatpush.bf16.msra.mxu0 %v401_v0  ;;  %v408_v3 = vld [vmem:[%s572_s1 + $0x70] sm:$0xff]  ;;  %v399_v6 = vld [vmem:[%s572_s1 + $0x28] sm:$0xff]  ;;  %66 = vst [vmem:[#allocation1] ss:$9 sm:$0xff] %v28_v4 }
   0x3   :  { %180 = vmatpush.bf16.msra.mxu1 %v409_v1  ;;  %v413_v5 = vld [vmem:[%s574_s3 + $0x18] sm:$0xff]  ;;  %v407_v7 = vld [vmem:[%s572_s1 + $0x68] sm:$0xff]  ;;  %v412_v8 = vld [vmem:[%s574_s3 + $0x10] sm:$0xff] }
   0x4   :  { %239 = vmatpush.bf16.msra.mxu2 %v413_v5 }
   0x6   :  { %168 = vmatpush.bf16.msra.mxu0 %v400_v2 }
   0x7   :  { %181 = vmatpush.bf16.msra.mxu1 %v408_v3 }
   0x8   :  { %12 = vsyncpa [#allocation3], 0  ;;  %v398_v9 = vld [vmem:[%s572_s1 + $0x20] sm:$0xff]  ;;  %240 = vmatpush.bf16.msra.mxu2 %v412_v8  ;;  %v397_v11 = vld [vmem:[%s572_s1 + $0x18] sm:$0xff]  ;;  %vm231_vm0 = vcmask 523264   ;;  %vm262_vm1 = vcmask 130048  }
   0x9   :  { %v406_v10 = vld [vmem:[%s572_s1 + $0x60] sm:$0xff]  ;;  %v405_v12 = vld [vmem:[%s572_s1 + $0x58] sm:$0xff]  ;;  %v396_v13 = vld [vmem:[%s572_s1 + $0x10] sm:$0xff]  ;;  %vm279_vm2 = vcmask 74752   ;;  %s299_s24 = sshll.u32 %s578_s7, 4  ;;  %s300_s24 = int_to_ptr.hbm [resolvable:$true] %s299_s24 }
   0xa   :  { %169 = vmatpush.bf16.msra.mxu0 %v399_v6  ;;  %v404_v14 = vld [vmem:[%s572_s1 + $0x50] sm:$0xff]  ;;  %v395_v15 = vld [vmem:[%s572_s1 + $0x8] sm:$0xff]  ;;  %v394_v17 = vld [vmem:[%s572_s1] sm:$0xff] }
   0xb   :  { %182 = vmatpush.bf16.msra.mxu1 %v407_v7  ;;  %v403_v16 = vld [vmem:[%s572_s1 + $0x48] sm:$0xff]  ;;  %v402_v18 = vld [vmem:[%s572_s1 + $0x40] sm:$0xff] }
   0xc   :  { %v67_v19 = vld [vmem:[#allocation1] sm:$0xff]  ;;  %v68_v20 = vld [vmem:[#allocation1 + $0x9] sm:$0xff] }
   0xd   :  { %v411_v21 = vld [vmem:[%s574_s3 + $0x8] sm:$0xff]  ;;  %v410_v22 = vld [vmem:[%s574_s3] sm:$0xff] }
   0xe   :  { %170 = vmatpush.bf16.msra.mxu0 %v398_v9  ;;  %241 = vmatpush.bf16.msra.mxu2 %v411_v21  ;;  %v416_v23 = vld [vmem:[%s573_s2] ss:$0 sm:$0xff] }
   0xf   :  { %183 = vmatpush.bf16.msra.mxu1 %v406_v10  ;;  %v414_v32 = vld [vmem:[%s576_s5] sm:$0xff] }
  0x10   :  { %273 = vmatpush.bf16.msra.mxu3 %v414_v32  ;;  %v417_v33 = vld [vmem:[%s575_s4] ss:$0 sm:$0xff]  ;;  %s449_s4 = smov [#allocation2]  }
  0x11   :  { %v418_v39 = vld [vmem:[%s577_s6] ss:$0 sm:$0xff]  ;;  %s297_s5 = sshll.u32 %s449_s4, 4  ;;  %s298_s5 = int_to_ptr.vmem [resolvable:$true] %s297_s5 }
  0x12   :  { %171 = vmatpush.bf16.msra.mxu0 %v397_v11  ;;  %242 = vmatpush.bf16.msra.mxu2 %v410_v22 }
  0x13   :  { %184 = vmatpush.bf16.msra.mxu1 %v405_v12 }
  0x16   :  { %172 = vmatpush.bf16.msra.mxu0 %v396_v13 }
  0x17   :  { %185 = vmatpush.bf16.msra.mxu1 %v404_v14 }
  0x1a   :  { %173 = vmatpush.bf16.msra.mxu0 %v395_v15 }
  0x1b   :  { %186 = vmatpush.bf16.msra.mxu1 %v403_v16 }
  0x1e   :  { %174 = vmatpush.bf16.msra.mxu0 %v394_v17 }
  0x1f   :  { %187 = vmatpush.bf16.msra.mxu1 %v402_v18 }
  0x21   :  { %175 = vmatmul.bf16.vlgmr.msra.gmra.mxu0 %v67_v19 }
  0x22   :  { %188 = vmatmul.bf16.vlgmr.msra.gmra.mxu1 %v68_v20 }
  0x9e   :  { %v176_v24 = vpop.f32.mrf.mxu0 }
  0x9f   :  { %v189_v25 = vpop.f32.mrf.mxu1  ;;  %v177_v26 = vadd.f32 %v416_v23, %v176_v24 }
  0xa1   :  { %v190_v27 = vadd.f32 %v189_v25, %v177_v26 }
  0xa3   :  { %v193_v28 = vmax.f32 %v190_v27, 0.0 }
  0xa5   :  { %v194_v29 = vpack.c.bf16 %v193_v28, %v193_v28 }
  0xa6   :  { %v178_v30 = vpop.f32.mrf.mxu0 }
  0xa7   :  { %v191_v31 = vpop.f32.mrf.mxu1  ;;  %388 = vmatmul.msk.bf16.vlgmr.msra.gmra.mxu2 %vm231_vm0, %v194_v29 }
 0x12a   :  { %v244_v34 = vpop.f32.mrf.mxu2 }
 0x12b   :  { %v245_v35 = vadd.f32 %v417_v33, %v244_v34 }
 0x12d   :  { %v248_v36 = vmax.f32 %v245_v35, 0.0 }
 0x12f   :  { %v249_v37 = vpack.c.bf16 %v248_v36, %v248_v36 }
 0x131   :  { %393 = vmatmul.msk.bf16.vlgmr.msra.gmra.mxu3 %vm262_vm1, %v249_v37 }
 0x132   :  { %v246_v38 = vpop.f32.mrf.mxu2 }
 0x1b4   :  { %v275_v40 = vpop.f32.mrf.mxu3 }
 0x1b5   :  { %v276_v41 = vadd.f32 %v418_v39, %v275_v40 }
 0x1b7   :  { %v280_v42 = vsel %vm279_vm2, %v276_v41, -inf }
 0x1b8   :  { %281 = vmax.xlane.f32.xlu0 %v280_v42 }
 0x1bc   :  { %v277_v43 = vpop.f32.mrf.mxu3 }
 0x22b   :  { %v282_v44 = vpop.xlane.xlu0 %281 }
 0x22c   :  { %v283_v45 = vsub.f32 %v276_v41, %v282_v44 }
 0x22e   :  { %v284_v46 = vmul.f32 1.442695, %v283_v45 }
 0x230   :  { %419 = vpow2.f32 %v284_v46 }
 0x236   :  { %v420_v47 = vpop.eup %419 }
 0x237   :  { %v286_v48 = vsel %vm279_vm2, %v420_v47, 0.0 }
 0x238   :  { %287 = vadd.xlane.f32.xlu0 %v286_v48 }
 0x2ab   :  { %v288_v49 = vpop.xlane.xlu0 %287 }
 0x2ac   :  { %421 = vrcp.f32 %v288_v49 }
 0x2b2   :  { %v422_v50 = vpop.eup %421 }
 0x2b3   :  { %v290_v51 = vmul.f32 %v422_v50, %v420_v47 }
 0x2b5   :  { %291 = vst.msk [vmem:[#allocation2] sm:$0x3] %vm279_vm2, %v290_v51 }
 0x2b6   :  { %302 = dma.vmem_to_hbm [thread:$0]  %s298_s5, 32, %s300_s24, [#allocation3]  }
 0x2b7   :  { %447 = dma.done.wait [#allocation3], 32  }
 0x2b8   :  { %448 = vsyncadd [#allocation3], 4294967264 }
 0x2b9   :  { %307 = vsyncpa [#allocation3], 1 }

</bundles_post_ra>
